<compile_context>
chip_gen: v7x
topology: tpu7x:2x2x1
jax: 0.10.0
libtpu: 0.0.40
codegen_flags: <defaults>
</compile_context>

<pallas_src>
import jax
import jax.numpy as jnp
from jax.experimental import pallas as pl
from jax.experimental.pallas import tpu as pltpu


def _round_up(x, m):
    return ((x + m - 1) // m) * m


def _vmem_block_budget():
    """Per-grid-step input-block budget, generation aware."""
    try:
        info = pltpu.get_tpu_info()
        cap = getattr(info, "vmem_capacity_bytes", None)
        if cap is not None and cap <= 80 * 1024 * 1024:   # v7x: 64 MiB physical
            return 4 * 1024 * 1024
        return 6 * 1024 * 1024                            # v5e / v6e: 128 MiB
    except Exception:
        return 4 * 1024 * 1024                            # conservative fallback


def _pick_tiling(B, C, Np, itemsizes, sub, budget_bytes):
    """Balanced batch tiling: (tb rows per step, G grid steps)."""
    t_is, r_is, c_is = itemsizes
    per_row_in = C * Np * (t_is + r_is) + Np * c_is        # streamed bytes / row
    per_row_tmp = 4 * Np * 4                               # f32 dsum/mask/cast temps
    tb_max = max(sub, (budget_bytes // (per_row_in + per_row_tmp)) // sub * sub)

    Bs = _round_up(B, sub)
    G = pl.cdiv(Bs, tb_max)
    # Keep both TensorCores busy on v7x when the batch allows it (one extra
    # grid step is ~0.35 us elsewhere, i.e. harmless).
    if Bs >= 2 * sub:
        G = max(G, 2)
        G += G % 2                                         # balanced per-core work
    tb = _round_up(pl.cdiv(Bs, G), sub)
    return tb, G


def _netloss_kernel(t_ref, r_ref, c_ref, rl_ref, l1_ref):
    # t_ref, r_ref : (TB, C*Np)  row-major flatten of (TB, C, Np)
    # c_ref        : (TB, Np)
    # rl_ref/l1_ref: (8, 128)    per-grid-step partial sums (scalar broadcast)
    f32 = jnp.float32
    Np = c_ref.shape[1]
    C = t_ref.shape[1] // Np

    # Accumulate sum_c |t - r| per point directly from lane-aligned ref slices
    # (no (TB, C*Np) temporary; upcast each slice to f32 before the subtract).
    dsum = jnp.abs(t_ref[:, 0:Np].astype(f32) - r_ref[:, 0:Np].astype(f32))
    for j in range(1, C):
        lo = j * Np
        dsum = dsum + jnp.abs(t_ref[:, lo:lo + Np].astype(f32)
                              - r_ref[:, lo:lo + Np].astype(f32))   # (TB, Np)

    c = c_ref[...].astype(f32)                              # (TB, Np)
    mask = 1.0 - c
    # |t*m - r*m| == |m| * |t - r|  (keep |m| so arbitrary cmap stays exact;
    # it is one cheap VPU pass over (TB, Np), well inside slack).
    abs_sum = jnp.sum(jnp.abs(mask) * dsum, axis=1, keepdims=True)  # (TB, 1)
    num_wnc = jnp.sum(mask, axis=1, keepdims=True)                  # (TB, 1)

    # L1Loss(mean over C*N) * N / (num_wnc + eps) == abs_sum / (C*(num_wnc+eps))
    per_b = abs_sum / (f32(C) * (num_wnc + f32(1e-7)))              # (TB, 1)

    rl_ref[...] = jnp.broadcast_to(jnp.sum(per_b), rl_ref.shape)
    l1_ref[...] = jnp.broadcast_to(jnp.sum(jnp.abs(c)), l1_ref.shape)


def net_loss(target, restruct, cmap):
    B, C, N = target.shape
    assert restruct.shape == (B, C, N)
    assert cmap.shape == (B, 1, N)

    itemsizes = tuple(jnp.dtype(a.dtype).itemsize for a in (target, restruct, cmap))
    sub = 8 if min(itemsizes) >= 4 else 16                  # sublane tile (f32 / bf16)

    # --- pad N to a lane multiple (cmap padded with 1.0 -> mask 0, no effect
    # on num_wnc / abs_sum; |cmap| pad contribution is corrected below) -------
    Np = _round_up(N, 128)
    padN = Np - N
    t, r, c = target, restruct, cmap
    if padN:
        t = jnp.pad(t, ((0, 0), (0, 0), (0, padN)))
        r = jnp.pad(r, ((0, 0), (0, 0), (0, padN)))
        c = jnp.pad(c, ((0, 0), (0, 0), (0, padN)), constant_values=1.0)

    t2 = t.reshape(B, C * Np)
    r2 = r.reshape(B, C * Np)
    c2 = c.reshape(B, Np)

    # --- balanced batch tiling ----------------------------------------------
    budget = _vmem_block_budget()
    tb, G = _pick_tiling(B, C, Np, itemsizes, sub, budget)
    Bp = G * tb
    if Bp != B:
        padB = Bp - B
        # zero rows: t=r=0 and cmap=0 -> per_b = 0 and |cmap| sum = 0
        t2 = jnp.pad(t2, ((0, padB), (0, 0)))
        r2 = jnp.pad(r2, ((0, padB), (0, 0)))
        c2 = jnp.pad(c2, ((0, padB), (0, 0)))

    # --- scoped-VMEM limit covering the double-buffered footprint ------------
    block_in_bytes = tb * (C * Np * (itemsizes[0] + itemsizes[1]) + Np * itemsizes[2])
    tmp_bytes = tb * Np * 4 * 4
    vmem_limit = int(min(48 * 1024 * 1024,
                         max(32 * 1024 * 1024,
                             2 * block_in_bytes + tmp_bytes + (2 << 20))))

    rl_parts, l1_parts = pl.pallas_call(
        _netloss_kernel,
        out_shape=(
            jax.ShapeDtypeStruct((G * 8, 128), jnp.float32),
            jax.ShapeDtypeStruct((G * 8, 128), jnp.float32),
        ),
        grid_spec=pltpu.PrefetchScalarGridSpec(
            num_scalar_prefetch=0,
            grid=(G,),
            in_specs=[
                pl.BlockSpec((tb, C * Np), lambda g: (g, 0)),
                pl.BlockSpec((tb, C * Np), lambda g: (g, 0)),
                pl.BlockSpec((tb, Np), lambda g: (g, 0)),
            ],
            out_specs=(
                pl.BlockSpec((8, 128), lambda g: (g, 0)),
                pl.BlockSpec((8, 128), lambda g: (g, 0)),
            ),
        ),
        compiler_params=pltpu.CompilerParams(
            dimension_semantics=("parallel",),      # independent per-step partials
            vmem_limit_bytes=vmem_limit),
    )(t2, r2, c2)

    rl_sum = jnp.sum(rl_parts.reshape(G, 8, 128)[:, 0, 0])
    l1_sum = jnp.sum(l1_parts.reshape(G, 8, 128)[:, 0, 0])
    if padN:
        # each real row's padded cmap lanes contributed exactly 1.0 apiece
        l1_sum = l1_sum - jnp.float32(B * padN)

    restruct_loss = rl_sum / jnp.float32(B)
    l1_loss = l1_sum / jnp.float32(B * N)
    return restruct_loss, l1_loss


def net_loss_ref(target, restruct, cmap):
    """Pure-JAX reference mirroring the PyTorch forward exactly (f32 math)."""
    target = target.astype(jnp.float32)
    restruct = restruct.astype(jnp.float32)
    cmap = cmap.astype(jnp.float32)
    B, C, N = target.shape
    mask = 1.0 - cmap
    num_wnc = jnp.sum(mask, axis=(1, 2))                       # (B,)
    tm = target * mask
    rm = restruct * mask
    per = jnp.mean(jnp.abs(tm - rm), axis=(1, 2)) * N / (num_wnc + 1e-7)
    restruct_loss = jnp.mean(per)
    l1_loss = jnp.mean(jnp.abs(cmap))
    return restruct_loss, l1_loss


if __name__ == "__main__":
    # NetLoss has no learnable parameters (only nn.L1Loss), so nothing to init.
    key = jax.random.PRNGKey(0)

    def run_case(B, C, N, dtype, tol):
        kk = jax.random.fold_in(key, B * 100000 + C * 1000 + N)
        k1, k2, k3 = jax.random.split(kk, 3)
        target = jax.random.normal(k1, (B, C, N), dtype=jnp.float32).astype(dtype)
        restruct = jax.random.normal(k2, (B, C, N), dtype=jnp.float32).astype(dtype)
        cmap = (jax.random.uniform(k3, (B, 1, N), dtype=jnp.float32) > 0.5).astype(dtype)

        rl, l1 = net_loss(target, restruct, cmap)
        rl = jax.block_until_ready(rl)
        l1 = jax.block_until_ready(l1)

        rl_ref, l1_ref = net_loss_ref(target, restruct, cmap)
        assert jnp.allclose(rl, rl_ref, rtol=tol, atol=tol), (B, C, N, dtype, rl, rl_ref)
        assert jnp.allclose(l1, l1_ref, rtol=tol, atol=tol), (B, C, N, dtype, l1, l1_ref)

    run_case(2, 4, 128, jnp.float32, 1e-5)    # lane-aligned main case
    run_case(5, 3, 100, jnp.float32, 1e-5)    # exercises N- and batch-padding paths
    run_case(4, 2, 128, jnp.bfloat16, 1e-4)   # bf16 streaming, per-slice upcast in kernel

    print("KERNEL_OK")
</pallas_src>

<mosaic_0001>
module attributes {stable_mosaic.version = 11 : i64} {
  func.func @_netloss_kernel(%arg0: i32, %arg1: memref<8x512xf32, #tpu.memory_space<vmem>>, %arg2: memref<8x512xf32, #tpu.memory_space<vmem>>, %arg3: memref<8x128xf32, #tpu.memory_space<vmem>>, %arg4: memref<8x128xf32, #tpu.memory_space<vmem>>, %arg5: memref<8x128xf32, #tpu.memory_space<vmem>>) attributes {dimension_semantics = [#tpu.dimension_semantics<parallel>], iteration_bounds = array<i64: 1>, scalar_prefetch = 0 : i64, scratch_operands = 0 : i64, tpu.core_type = #tpu.core_type<tc>, window_params = [{transform_indices = @transform_0, window_bounds = array<i64: 8, 512>}, {transform_indices = @transform_1, window_bounds = array<i64: 8, 512>}, {transform_indices = @transform_2, window_bounds = array<i64: 8, 128>}, {transform_indices = @transform_3, window_bounds = array<i64: 8, 128>}, {transform_indices = @transform_4, window_bounds = array<i64: 8, 128>}]} {
    %c0 = arith.constant 0 : index
    %c0_0 = arith.constant 0 : index
    %0 = vector.load %arg1[%c0, %c0_0] : memref<8x512xf32, #tpu.memory_space<vmem>>, vector<8x128xf32>
    %c0_1 = arith.constant 0 : index
    %c0_2 = arith.constant 0 : index
    %1 = vector.load %arg2[%c0_1, %c0_2] : memref<8x512xf32, #tpu.memory_space<vmem>>, vector<8x128xf32>
    %2 = arith.subf %0, %1 : vector<8x128xf32>
    %3 = math.absf %2 : vector<8x128xf32>
    %c0_3 = arith.constant 0 : index
    %c128 = arith.constant 128 : index
    %4 = vector.load %arg1[%c0_3, %c128] : memref<8x512xf32, #tpu.memory_space<vmem>>, vector<8x128xf32>
    %c0_4 = arith.constant 0 : index
    %c128_5 = arith.constant 128 : index
    %5 = vector.load %arg2[%c0_4, %c128_5] : memref<8x512xf32, #tpu.memory_space<vmem>>, vector<8x128xf32>
    %6 = arith.subf %4, %5 : vector<8x128xf32>
    %7 = math.absf %6 : vector<8x128xf32>
    %8 = arith.addf %3, %7 : vector<8x128xf32>
    %c0_6 = arith.constant 0 : index
    %c256 = arith.constant 256 : index
    %9 = vector.load %arg1[%c0_6, %c256] : memref<8x512xf32, #tpu.memory_space<vmem>>, vector<8x128xf32>
    %c0_7 = arith.constant 0 : index
    %c256_8 = arith.constant 256 : index
    %10 = vector.load %arg2[%c0_7, %c256_8] : memref<8x512xf32, #tpu.memory_space<vmem>>, vector<8x128xf32>
    %11 = arith.subf %9, %10 : vector<8x128xf32>
    %12 = math.absf %11 : vector<8x128xf32>
    %13 = arith.addf %8, %12 : vector<8x128xf32>
    %c0_9 = arith.constant 0 : index
    %c384 = arith.constant 384 : index
    %14 = vector.load %arg1[%c0_9, %c384] : memref<8x512xf32, #tpu.memory_space<vmem>>, vector<8x128xf32>
    %c0_10 = arith.constant 0 : index
    %c384_11 = arith.constant 384 : index
    %15 = vector.load %arg2[%c0_10, %c384_11] : memref<8x512xf32, #tpu.memory_space<vmem>>, vector<8x128xf32>
    %16 = arith.subf %14, %15 : vector<8x128xf32>
    %17 = math.absf %16 : vector<8x128xf32>
    %18 = arith.addf %13, %17 : vector<8x128xf32>
    %c0_12 = arith.constant 0 : index
    %c0_13 = arith.constant 0 : index
    %19 = vector.load %arg3[%c0_12, %c0_13] : memref<8x128xf32, #tpu.memory_space<vmem>>, vector<8x128xf32>
    %cst = arith.constant 1.000000e+00 : f32
    %20 = vector.broadcast %cst : f32 to vector<8x128xf32>
    %21 = arith.subf %20, %19 : vector<8x128xf32>
    %22 = math.absf %21 : vector<8x128xf32>
    %23 = arith.mulf %22, %18 : vector<8x128xf32>
    %cst_14 = arith.constant dense<0.000000e+00> : vector<8xf32>
    %24 = vector.multi_reduction <add>, %23, %cst_14 [1] : vector<8x128xf32> to vector<8xf32>
    %25 = vector.shape_cast %24 : vector<8xf32> to vector<8x1xf32>
    %cst_15 = arith.constant dense<0.000000e+00> : vector<8xf32>
    %26 = vector.multi_reduction <add>, %21, %cst_15 [1] : vector<8x128xf32> to vector<8xf32>
    %27 = vector.shape_cast %26 : vector<8xf32> to vector<8x1xf32>
    %cst_16 = arith.constant 1.000000e-07 : f32
    %28 = vector.broadcast %cst_16 : f32 to vector<8x1xf32>
    %29 = arith.addf %27, %28 : vector<8x1xf32>
    %cst_17 = arith.constant 4.000000e+00 : f32
    %30 = vector.broadcast %cst_17 : f32 to vector<8x1xf32>
    %31 = arith.mulf %30, %29 : vector<8x1xf32>
    %32 = arith.divf %25, %31 : vector<8x1xf32>
    %33 = vector.shape_cast %32 : vector<8x1xf32> to vector<1x8x1xf32>
    %cst_18 = arith.constant dense<0.000000e+00> : vector<1xf32>
    %34 = vector.multi_reduction <add>, %33, %cst_18 [1, 2] : vector<1x8x1xf32> to vector<1xf32>
    %35 = vector.shape_cast %34 : vector<1xf32> to vector<1x1x1xf32>
    %36 = vector.extract %35[0, 0, 0] : f32 from vector<1x1x1xf32>
    %37 = vector.broadcast %36 : f32 to vector<8x128xf32>
    %c0_19 = arith.constant 0 : index
    %c0_20 = arith.constant 0 : index
    %38 = vector.load %arg4[%c0_19, %c0_20] : memref<8x128xf32, #tpu.memory_space<vmem>>, vector<8x128xf32>
    tpu.vector_store %arg4[%c0_19, %c0_20], %37 {strides = array<i32>} : memref<8x128xf32, #tpu.memory_space<vmem>>, vector<8x128xf32>,
    %39 = math.absf %19 : vector<8x128xf32>
    %40 = vector.shape_cast %39 : vector<8x128xf32> to vector<1x8x128xf32>
    %cst_21 = arith.constant dense<0.000000e+00> : vector<1xf32>
    %41 = vector.multi_reduction <add>, %40, %cst_21 [1, 2] : vector<1x8x128xf32> to vector<1xf32>
    %42 = vector.shape_cast %41 : vector<1xf32> to vector<1x1x1xf32>
    %43 = vector.extract %42[0, 0, 0] : f32 from vector<1x1x1xf32>
    %44 = vector.broadcast %43 : f32 to vector<8x128xf32>
    %c0_22 = arith.constant 0 : index
    %c0_23 = arith.constant 0 : index
    %45 = vector.load %arg5[%c0_22, %c0_23] : memref<8x128xf32, #tpu.memory_space<vmem>>, vector<8x128xf32>
    tpu.vector_store %arg5[%c0_22, %c0_23], %44 {strides = array<i32>} : memref<8x128xf32, #tpu.memory_space<vmem>>, vector<8x128xf32>,
    return
  }
  func.func @transform_0(%arg0: i32) -> (i32, i32) {
    %c0_i32 = arith.constant 0 : i32
    %c0_i32_0 = arith.constant 0 : i32
    return %arg0, %c0_i32 : i32, i32
  }
  func.func @transform_1(%arg0: i32) -> (i32, i32) {
    %c0_i32 = arith.constant 0 : i32
    %c0_i32_0 = arith.constant 0 : i32
    return %arg0, %c0_i32 : i32, i32
  }
  func.func @transform_2(%arg0: i32) -> (i32, i32) {
    %c0_i32 = arith.constant 0 : i32
    %c0_i32_0 = arith.constant 0 : i32
    return %arg0, %c0_i32 : i32, i32
  }
  func.func @transform_3(%arg0: i32) -> (i32, i32) {
    %c0_i32 = arith.constant 0 : i32
    %c0_i32_0 = arith.constant 0 : i32
    return %arg0, %c0_i32 : i32, i32
  }
  func.func @transform_4(%arg0: i32) -> (i32, i32) {
    %c0_i32 = arith.constant 0 : i32
    %c0_i32_0 = arith.constant 0 : i32
    return %arg0, %c0_i32 : i32, i32
  }
}

</mosaic_0001>

<bundles_post_ra>
// kernel: tpu_custom_call.1
= control target key start
LH: loop header
LB: loop body
LE: loop exit
PB: predicated region body
PF: predicated region fallthrough
CT: control target
= control target key end

     0   :  { %10 = vsyncpa [#allocation3], 0  ;;  %s358_s0 = inlined_call_operand.hbm [shape: f32[8,512], index: 0, kind: input, shape index: {}]   ;;  %s359_s1 = inlined_call_operand.hbm [shape: f32[8,512], index: 1, kind: input, shape index: {}]   ;;  %s360_s2 = inlined_call_operand.hbm [shape: f32[8,128], index: 2, kind: input, shape index: {}]   ;;  %s361_s3 = inlined_call_operand.hbm [shape: f32[8,128], index: 3, kind: output, shape index: {0}]   ;;  %s362_s4 = inlined_call_operand.hbm [shape: f32[8,128], index: 4, kind: output, shape index: {1}]  }
   0x1   :  { %11 = vsyncpa [#allocation6], 0 }
   0x2   :  { %12 = vsyncpa [#allocation4], 0 }
   0x3   :  { %13 = vsyncpa [#allocation10], 0  ;;  %s268_s15 = smov [#allocation5]   ;;  %s269_s17 = smov [#allocation2]  }
   0x4   :  { %s30_s16 = sshll.u32 %s268_s15, 4  ;;  %s20_s18 = sshll.u32 %s269_s17, 4  ;;  %s31_s16 = int_to_ptr.vmem [resolvable:$true] %s30_s16  ;;  %s21_s18 = int_to_ptr.vmem [resolvable:$true] %s20_s18 }
   0x5   :  { %s150_s21 = scalar_lea.hbm %s359_s1, 512 }
   0x6   :  { %p151_p0 = scmp.ne.s32.totalorder %s359_s1, %s150_s21  ;;  %p154_p1 = scmp.lt.u32.totalorder %s150_s21, %s359_s1 }
   0x8   :  { %p156_p2 = pnand %p154_p1, %p151_p0 }
   0xa   :  { %159 = shalt.err (!%p156_p2)
}
   0xb   :  { %s160_s26 = scalar_lea.vmem %s31_s16, 512  ;;  %p165_p4 = scmp.lt.s32.totalorder %s31_s16, %s31_s16 }
   0xc   :  { %p161_p3 = scmp.ne.s32.totalorder %s31_s16, %s160_s26  ;;  %p166_p5 = scmp.lt.s32.totalorder %s160_s26, %s160_s26 }
   0xe   :  { %p167_p6 = por %p166_p5, %p165_p4 }
  0x10   :  { %p168_p7 = pnand %p167_p6, %p161_p3 }
  0x12   :  { %171 = shalt.err (!%p168_p7)
}
  0x13   :  { %33 = dma.hbm_to_vmem [thread:$0]  %s359_s1, 512, %s31_s16, [#allocation6]  }
  0x14   :  { %s172_s5 = scalar_lea.hbm %s358_s0, 512 }
  0x15   :  { %p173_p8 = scmp.ne.s32.totalorder %s358_s0, %s172_s5  ;;  %p176_p9 = scmp.lt.u32.totalorder %s172_s5, %s358_s0 }
  0x17   :  { %p178_p10 = pnand %p176_p9, %p173_p8 }
  0x19   :  { %181 = shalt.err (!%p178_p10)
}
  0x1a   :  { %s182_s10 = scalar_lea.vmem %s21_s18, 512  ;;  %p187_p12 = scmp.lt.s32.totalorder %s21_s18, %s21_s18 }
  0x1b   :  { %p183_p11 = scmp.ne.s32.totalorder %s21_s18, %s182_s10  ;;  %p188_p13 = scmp.lt.s32.totalorder %s182_s10, %s182_s10 }
  0x1d   :  { %p189_p0 = por %p188_p13, %p187_p12 }
  0x1f   :  { %p190_p1 = pnand %p189_p0, %p183_p11 }
  0x21   :  { %193 = shalt.err (!%p190_p1)
}
  0x22   :  { %23 = dma.hbm_to_vmem [thread:$0]  %s358_s0, 512, %s21_s18, [#allocation3]  }
  0x23   :  { %s270_s12 = smov [#allocation7]   ;;  %s194_s16 = scalar_lea.hbm %s360_s2, 128 }
  0x24   :  { %s40_s13 = sshll.u32 %s270_s12, 4  ;;  %p195_p2 = scmp.ne.s32.totalorder %s360_s2, %s194_s16  ;;  %s41_s13 = int_to_ptr.vmem [resolvable:$true] %s40_s13 }
  0x25   :  { %p198_p3 = scmp.lt.u32.totalorder %s194_s16, %s360_s2 }
  0x27   :  { %p200_p4 = pnand %p198_p3, %p195_p2 }
  0x29   :  { %203 = shalt.err (!%p200_p4)
}
  0x2a   :  { %s204_s22 = scalar_lea.vmem %s41_s13, 128  ;;  %p209_p6 = scmp.lt.s32.totalorder %s41_s13, %s41_s13 }
  0x2b   :  { %p205_p5 = scmp.ne.s32.totalorder %s41_s13, %s204_s22  ;;  %p210_p7 = scmp.lt.s32.totalorder %s204_s22, %s204_s22 }
  0x2d   :  { %p211_p8 = por %p210_p7, %p209_p6 }
  0x2f   :  { %p212_p9 = pnand %p211_p8, %p205_p5 }
  0x31   :  { %215 = shalt.err (!%p212_p9)
}
  0x32   :  { %43 = dma.hbm_to_vmem [thread:$0]  %s360_s2, 128, %s41_s13, [#allocation6]  }
  0x33   :  { %260 = dma.done.wait [#allocation3], 512  }
  0x34   :  { %261 = vsyncadd [#allocation3], 4294966784 }
  0x35   :  { %262 = dma.done.wait [#allocation6], 640  }
  0x36   :  { %263 = vsyncadd [#allocation6], 4294966656  ;;  %v72_v0 = vld [vmem:[#allocation7] sm:$0xff]  ;;  %v57_v5 = vld [vmem:[#allocation2 + $0x8] sm:$0xff]  ;;  %vm84_vm0 = vcmask 7168   ;;  %s271_s2 = smov [#allocation8]  }
  0x37   :  { %v53_v1 = vld [vmem:[#allocation2] sm:$0xff]  ;;  %v73_v3 = vsub.f32 1.0, %v72_v0  ;;  %v58_v6 = vld [vmem:[#allocation5 + $0x8] sm:$0xff]  ;;  %v62_v7 = vld [vmem:[#allocation2 + $0x10] sm:$0xff]  ;;  %v97_v30 = vand.u32 2147483647, %v72_v0 }
  0x38   :  { %v54_v2 = vld [vmem:[#allocation5] sm:$0xff]  ;;  %v59_v8 = vsub.f32 %v57_v5, %v58_v6  ;;  %v63_v9 = vld [vmem:[#allocation5 + $0x10] sm:$0xff]  ;;  %v67_v10 = vld [vmem:[#allocation2 + $0x18] sm:$0xff]  ;;  %s115_s23 = sshll.u32 %s271_s2, 4  ;;  %s272_s25 = smov [#allocation9]   ;;  %s116_s23 = int_to_ptr.vmem [resolvable:$true] %s115_s23 }
  0x39   :  { %v55_v4 = vsub.f32 %v53_v1, %v54_v2  ;;  %v68_v11 = vld [vmem:[#allocation5 + $0x18] sm:$0xff]  ;;  %78 = vadd.xlane.f32.xlu0 %v73_v3  ;;  %v64_v13 = vsub.f32 %v62_v7, %v63_v9  ;;  %v74_v20 = vand.u32 2147483647, %v73_v3  ;;  %s125_s26 = sshll.u32 %s272_s25, 4  ;;  %s216_s27 = scalar_lea.vmem %s116_s23, 128  ;;  %s126_s26 = int_to_ptr.vmem [resolvable:$true] %s125_s26 }
  0x3a   :  { %v69_v14 = vsub.f32 %v67_v10, %v68_v11  ;;  %v60_v15 = vand.u32 2147483647, %v59_v8  ;;  %p217_p10 = scmp.ne.s32.totalorder %s116_s23, %s216_s27  ;;  %p221_p11 = scmp.lt.s32.totalorder %s116_s23, %s116_s23 }
  0x3b   :  { %v56_v12 = vand.u32 2147483647, %v55_v4  ;;  %v65_v16 = vand.u32 2147483647, %v64_v13  ;;  %p222_p12 = scmp.lt.s32.totalorder %s216_s27, %s216_s27 }
  0x3c   :  { %v70_v18 = vand.u32 2147483647, %v69_v14 }
  0x3d   :  { %v61_v17 = vadd.f32 %v60_v15, %v56_v12  ;;  %p223_p13 = por %p222_p12, %p221_p11 }
  0x3f   :  { %v66_v19 = vadd.f32 %v65_v16, %v61_v17  ;;  %p224_p0 = pnand %p223_p13, %p217_p10 }
  0x41   :  { %v71_v21 = vadd.f32 %v70_v18, %v66_v19 }
  0x43   :  { %v75_v22 = vmul.f32 %v74_v20, %v71_v21 }
  0x45   :  { %76 = vadd.xlane.f32.xlu0 %v75_v22 }
  0xc6   :  { %v79_v23 = vpop.xlane.xlu0 %78 }
  0xc7   :  { %v80_v24 = vadd.f32 1e-07, %v79_v23 }
  0xc9   :  { %v81_v25 = vmul.f32 4.0, %v80_v24 }
  0xcb   :  { %148 = vrcp.f32 %v81_v25 }
  0xd2   :  { %v77_v26 = vpop.xlane.xlu0 %76 }
  0xd5   :  { %v149_v27 = vpop.eup %148 }
  0xd6   :  { %v83_v28 = vmul.f32 %v149_v27, %v77_v26 }
  0xd8   :  { %v85_v29 = vsel %vm84_vm0, %v83_v28, 0.0 }
  0xd9   :  { %86 = vadd.xlane.f32.xlu1 %v85_v29 }
  0xdd   :  { %98 = vadd.xlane.f32.xlu1 %v97_v30 }
 0x166   :  { %v87_v31 = vpop.xlane.xlu1 %86 }
 0x167   :  { %v88_v32 = vrot.slane %v87_v31, 4 }
 0x169   :  { %v89_v33 = vadd.f32 %v88_v32, %v87_v31 }
 0x16a   :  { %v99_v34 = vpop.xlane.xlu1 %98 }
 0x16b   :  { %v90_v35 = vrot.slane %v89_v33, 2  ;;  %v100_v36 = vrot.slane %v99_v34, 4 }
 0x16d   :  { %v101_v37 = vadd.f32 %v100_v36, %v99_v34  ;;  %v91_v38 = vadd.f32 %v90_v35, %v89_v33 }
 0x16f   :  { %v102_v39 = vrot.slane %v101_v37, 2  ;;  %v92_v40 = vrot.slane %v91_v38, 1 }
 0x171   :  { %v103_v41 = vadd.f32 %v102_v39, %v101_v37  ;;  %v93_v42 = vadd.f32 %v92_v40, %v91_v38 }
 0x173   :  { %139 = vpush %v93_v42  ;;  %v104_v43 = vrot.slane %v103_v41, 1 }
 0x175   :  { %v105_v44 = vadd.f32 %v104_v43, %v103_v41 }
 0x177   :  { %141 = vpush %v105_v44 }
 0x1a4   :  { %s140_s24 = spop %139 }
 0x1a5   :  { %v95_v45 = vstv %s140_s24 }
 0x1a6   :  { %96 = vst [vmem:[#allocation8] sm:$0xff] %v95_v45 }
 0x1a7   :  { %227 = shalt.err (!%p224_p0)
}
 0x1a8   :  { %s228_s30 = scalar_lea.hbm %s361_s3, 128 }
 0x1a9   :  { %p229_p1 = scmp.ne.s32.totalorder %s361_s3, %s228_s30  ;;  %p232_p2 = scmp.lt.u32.totalorder %s228_s30, %s361_s3 }
 0x1ab   :  { %p234_p3 = pnand %p232_p2, %p229_p1 }
 0x1ad   :  { %237 = shalt.err (!%p234_p3)
}
 0x1ae   :  { %118 = dma.vmem_to_hbm [thread:$0]  %s116_s23, 128, %s361_s3, [#allocation4]  }
 0x1af   :  { %s142_s1 = spop %141  ;;  %s238_s11 = scalar_lea.vmem %s126_s26, 128 }
 0x1b0   :  { %v107_v46 = vstv %s142_s1  ;;  %p239_p4 = scmp.ne.s32.totalorder %s126_s26, %s238_s11  ;;  %p243_p5 = scmp.lt.s32.totalorder %s126_s26, %s126_s26 }
 0x1b1   :  { %108 = vst [vmem:[#allocation9] sm:$0xff] %v107_v46  ;;  %p244_p6 = scmp.lt.s32.totalorder %s238_s11, %s238_s11 }
 0x1b3   :  { %p245_p7 = por %p244_p6, %p243_p5 }
 0x1b5   :  { %p246_p8 = pnand %p245_p7, %p239_p4 }
 0x1b7   :  { %249 = shalt.err (!%p246_p8)
}
 0x1b8   :  { %s250_s14 = scalar_lea.hbm %s362_s4, 128 }
 0x1b9   :  { %p251_p9 = scmp.ne.s32.totalorder %s362_s4, %s250_s14  ;;  %p254_p10 = scmp.lt.u32.totalorder %s250_s14, %s362_s4 }
 0x1bb   :  { %p256_p11 = pnand %p254_p10, %p251_p9 }
 0x1bd   :  { %259 = shalt.err (!%p256_p11)
}
 0x1be   :  { %128 = dma.vmem_to_hbm [thread:$0]  %s126_s26, 128, %s362_s4, [#allocation10]  }
 0x1bf   :  { %264 = dma.done.wait [#allocation4], 128  }
 0x1c0   :  { %265 = vsyncadd [#allocation4], 4294967168 }
 0x1c1   :  { %266 = dma.done.wait [#allocation10], 128  }
 0x1c2   :  { %267 = vsyncadd [#allocation10], 4294967168 }
 0x1c3   :  { %135 = vsyncpa [#allocation3], 1 }
 0x1c4   :  { %136 = vsyncpa [#allocation6], 1 }
 0x1c5   :  { %137 = vsyncpa [#allocation4], 1 }
 0x1c6   :  { %138 = vsyncpa [#allocation10], 1 }

</bundles_post_ra>
